<compile_context>
chip_gen: v5e
topology: v5e:2x2
jax: 0.10.0
libtpu: 0.0.40
codegen_flags: <defaults>
</compile_context>

<pallas_src>
import math

import jax
import jax.numpy as jnp
from jax.experimental import pallas as pl
from jax.experimental.pallas import tpu as pltpu


def _round_up(n, m):
    return ((n + m - 1) // m) * m


def _posemb_kernel(x_ref, w_ref, o_ref):
    # x_ref: (TB, 1) f32, w_ref: (1, half) f32, o_ref: (TB, 1 + 2*half) f32
    half = w_ref.shape[1]
    # Reassociate the 2*pi scale onto the tiny (1, half) weights row: one VPU op
    # per tile instead of a full (TB, half) multiply.  Slightly different
    # rounding than the reference's (x*w)*2*pi; well inside 1e-5 tolerance.
    w2 = w_ref[...] * (2.0 * math.pi)              # (1, half)
    x = x_ref[...]                                  # (TB, 1)
    freqs = x * w2                                  # (TB, half) broadcast outer product (VPU)
    # Full [x | sin | cos] row written from the kernel -> no wrapper concat,
    # no extra HBM pass over the output.
    o_ref[:, 0:1] = x.astype(o_ref.dtype)
    o_ref[:, 1:1 + half] = jnp.sin(freqs).astype(o_ref.dtype)
    o_ref[:, 1 + half:] = jnp.cos(freqs).astype(o_ref.dtype)


def random_or_learned_sinusoidal_pos_emb(x, weights, *, block_b=None):
    """x: (b,) float; weights: (half_dim,) float -> (b, 1 + 2*half_dim) float32."""
    b = x.shape[0]
    half_dim = weights.shape[0]
    out_w = 1 + 2 * half_dim

    # Batch tile: multiple of 8 sublanes.  Large cap (4096 rows) amortizes the
    # ~0.35us per-grid-step overhead while staying far below scoped-VMEM limits
    # even double-buffered (4096 * out_w f32 is single-digit MiB at realistic
    # dim).  When b is large we target >=2 grid steps so "parallel" actually
    # shards the batch axis across v7x's two TensorCores.
    if block_b is None:
        cap = 4096
        block_b = min(_round_up(pl.cdiv(b, 2), 8), cap, _round_up(b, 8))
        block_b = max(block_b, 8)

    x2d = x.astype(jnp.float32).reshape(b, 1)
    w2d = weights.astype(jnp.float32).reshape(1, half_dim)

    # cdiv grid: Pallas masks the ragged last block -> no pad / slice in the wrapper.
    grid = (pl.cdiv(b, block_b),)

    out = pl.pallas_call(
        _posemb_kernel,
        out_shape=jax.ShapeDtypeStruct((b, out_w), jnp.float32),
        grid_spec=pl.GridSpec(
            grid=grid,
            in_specs=[
                pl.BlockSpec((block_b, 1), lambda i: (i, 0)),
                pl.BlockSpec((1, half_dim), lambda i: (0, 0)),
            ],
            out_specs=pl.BlockSpec((block_b, out_w), lambda i: (i, 0)),
        ),
        compiler_params=pltpu.CompilerParams(
            dimension_semantics=("parallel",),
        ),
        cost_estimate=pl.CostEstimate(
            flops=int(2 * b * half_dim),
            transcendentals=int(2 * b * half_dim),
            bytes_accessed=int(4 * (b + half_dim + b * out_w)),
        ),
    )(x2d, w2d)

    # TODO(synk): at real sizes this embedding should be fused into the first
    # Linear of the downstream time-embedding MLP (as a standalone call it is
    # dominated by dispatch + one HBM round trip of a tiny tensor).
    return out


def reference(x, weights):
    x2 = x.reshape(-1, 1).astype(jnp.float32)
    freqs = x2 * weights.reshape(1, -1).astype(jnp.float32) * 2.0 * math.pi
    return jnp.concatenate([x2, jnp.sin(freqs), jnp.cos(freqs)], axis=-1)


if __name__ == "__main__":
    dim = 32                     # module asserts dim % 2 == 0
    half_dim = dim // 2

    key = jax.random.PRNGKey(0)
    kx, kw, kx2 = jax.random.split(key, 3)
    # deterministic "parameter" init, matching nn.Parameter(torch.randn(half_dim))
    weights = jax.random.normal(kw, (half_dim,), dtype=jnp.float32)

    # small, block-aligned batch
    x = jax.random.normal(kx, (8,), dtype=jnp.float32)
    out = jax.block_until_ready(random_or_learned_sinusoidal_pos_emb(x, weights))
    assert out.shape == (8, dim + 1), out.shape
    assert jnp.allclose(out, reference(x, weights), atol=1e-5, rtol=1e-5), "mismatch (aligned batch)"

    # ragged batch: exercises the cdiv grid / masked partial last block path
    xr = jax.random.normal(kx2, (20,), dtype=jnp.float32)
    outr = jax.block_until_ready(random_or_learned_sinusoidal_pos_emb(xr, weights))
    assert outr.shape == (20, dim + 1), outr.shape
    assert jnp.allclose(outr, reference(xr, weights), atol=1e-5, rtol=1e-5), "mismatch (ragged batch)"

    print("KERNEL_OK")
</pallas_src>

<mosaic_0001>
module attributes {stable_mosaic.version = 11 : i64} {
  func.func @_posemb_kernel(%arg0: i32, %arg1: memref<8x1xf32, #tpu.memory_space<vmem>>, %arg2: memref<1x16xf32, #tpu.memory_space<vmem>>, %arg3: memref<8x33xf32, #tpu.memory_space<vmem>>) attributes {dimension_semantics = [#tpu.dimension_semantics<parallel>], iteration_bounds = array<i64: 1>, scalar_prefetch = 0 : i64, scratch_operands = 0 : i64, tpu.core_type = #tpu.core_type<tc>, window_params = [{transform_indices = @transform_0, window_bounds = array<i64: 8, 1>}, {pipeline_mode = #tpu.pipeline_mode<synchronous>, transform_indices = @transform_1, window_bounds = array<i64: 1, 16>}, {transform_indices = @transform_2, window_bounds = array<i64: 8, 33>}]} {
    %c0 = arith.constant 0 : index
    %c0_0 = arith.constant 0 : index
    %0 = vector.load %arg2[%c0, %c0_0] : memref<1x16xf32, #tpu.memory_space<vmem>>, vector<1x16xf32>
    %cst = arith.constant 6.28318548 : f32
    %1 = vector.broadcast %cst : f32 to vector<1x16xf32>
    %2 = arith.mulf %0, %1 : vector<1x16xf32>
    %c0_1 = arith.constant 0 : index
    %c0_2 = arith.constant 0 : index
    %3 = vector.load %arg1[%c0_1, %c0_2] : memref<8x1xf32, #tpu.memory_space<vmem>>, vector<8x1xf32>
    %4 = vector.broadcast %3 : vector<8x1xf32> to vector<8x16xf32>
    %5 = vector.broadcast %2 : vector<1x16xf32> to vector<8x16xf32>
    %6 = arith.mulf %4, %5 : vector<8x16xf32>
    %c0_3 = arith.constant 0 : index
    %c0_4 = arith.constant 0 : index
    %7 = vector.load %arg3[%c0_3, %c0_4] : memref<8x33xf32, #tpu.memory_space<vmem>>, vector<8x1xf32>
    tpu.vector_store %arg3[%c0_3, %c0_4], %3 {strides = array<i32>} : memref<8x33xf32, #tpu.memory_space<vmem>>, vector<8x1xf32>,
    %8 = math.sin %6 : vector<8x16xf32>
    %c0_5 = arith.constant 0 : index
    %c1 = arith.constant 1 : index
    %9 = vector.load %arg3[%c0_5, %c1] : memref<8x33xf32, #tpu.memory_space<vmem>>, vector<8x16xf32>
    tpu.vector_store %arg3[%c0_5, %c1], %8 {strides = array<i32>} : memref<8x33xf32, #tpu.memory_space<vmem>>, vector<8x16xf32>,
    %10 = math.cos %6 : vector<8x16xf32>
    %c0_6 = arith.constant 0 : index
    %c17 = arith.constant 17 : index
    %11 = vector.load %arg3[%c0_6, %c17] : memref<8x33xf32, #tpu.memory_space<vmem>>, vector<8x16xf32>
    tpu.vector_store %arg3[%c0_6, %c17], %10 {strides = array<i32>} : memref<8x33xf32, #tpu.memory_space<vmem>>, vector<8x16xf32>,
    return
  }
  func.func @transform_0(%arg0: i32) -> (i32, i32) {
    %c0_i32 = arith.constant 0 : i32
    %c0_i32_0 = arith.constant 0 : i32
    return %arg0, %c0_i32 : i32, i32
  }
  func.func @transform_1(%arg0: i32) -> (i32, i32) {
    %c0_i32 = arith.constant 0 : i32
    %c0_i32_0 = arith.constant 0 : i32
    %c0_i32_1 = arith.constant 0 : i32
    return %c0_i32, %c0_i32_0 : i32, i32
  }
  func.func @transform_2(%arg0: i32) -> (i32, i32) {
    %c0_i32 = arith.constant 0 : i32
    %c0_i32_0 = arith.constant 0 : i32
    return %arg0, %c0_i32 : i32, i32
  }
}

</mosaic_0001>

<bundles_post_ra>
// kernel: tpu_custom_call.1
= control target key start
LH: loop header
LB: loop body
LE: loop exit
PB: predicated region body
PF: predicated region fallthrough
CT: control target
= control target key end

     0   :  { %vm24_vm0 = vcmask 7168   ;;  %v406_v1 = vmov 0   ;;  %s499_s0 = inlined_call_operand.vmem [shape: f32[8,1], index: 0, kind: input, shape index: {}]   ;;  %s500_s1 = inlined_call_operand.vmem [shape: f32[1,16], index: 1, kind: input, shape index: {}]   ;;  %s501_s2 = inlined_call_operand.hbm [shape: f32[8,33], index: 2, kind: output, shape index: {}]  }
   0x1   :  { %v14_v0 = vld [vmem:[%s499_s0] sm:$0xff]  ;;  %379 = vset.pattern.permute.xlu0 %v406_v1 }
   0x2   :  { %25 = vst.msk [vmem:[#allocation2] sm:$0xff] %vm24_vm0, %v14_v0  ;;  %17 = vperm.xlu0 %379, %v14_v0  }
   0x3   :  { %7 = vsyncpa [#allocation3], 0  ;;  %v12_v2 = vld [vmem:[%s500_s1] sm:$0x1]  ;;  %v407_v18 = vmov 2102212464  }
   0x4   :  { %v13_v3 = vmul.f32 6.2831855, %v12_v2  ;;  %v408_v20 = vmov 920167782   ;;  %v409_v23 = vmov 1326507024  }
   0x5   :  { %v410_v25 = vmov 683565275   ;;  %v411_v27 = vmov 2475754826   ;;  %v412_v30 = vmov 2131351028  }
   0x6   :  { %v21_v4 = vperm.slane %v13_v3, 0  ;;  %s413_s0 = smov 17   ;;  %s414_s1 = smov 1  }
   0x7   :  { %s415_s13 = smov [#allocation2]   ;;  %s354_s17 = sshll.u32 %s501_s2, 4  ;;  %s355_s17 = int_to_ptr.hbm [resolvable:$true] %s354_s17 }
   0x8   :  { %s352_s14 = sshll.u32 %s415_s13, 4  ;;  %s353_s14 = int_to_ptr.vmem [resolvable:$true] %s352_s14 }
  0x74   :  { %v18_v5 = vpop.permute.xlu0 %17 }
  0x75   :  { %v438_v6 = vmul.f32 %v21_v4, %v18_v5 }
  0x77   :  { %v29_v7 = vand.u32 2139095040, %v438_v6  ;;  %v26_v10 = vand.u32 2147483647, %v438_v6  ;;  %vm28_vm13 = vcmp.lt.s32.totalorder %v438_v6, 0 }
  0x79   :  { %v30_v8 = vshrl.u32 %v29_v7, 23  ;;  %v33_v12 = vand.u32 8388607, %v26_v10  ;;  %vm27_vm14 = vcmp.le.f32.partialorder %v26_v10, 0.7853982 }
  0x7b   :  { %v363_v9 = vadd.s32 4294967169, %v30_v8  ;;  %v34_v16 = vor.u32 8388608, %v33_v12 }
  0x7d   :  { %v36_v11 = vadd.s32 1, %v363_v9  ;;  %v453_v37 = vshll.u32 %v34_v16, 8 }
  0x7f   :  { %vm37_vm1 = vcmp.gt.s32.totalorder %v36_v11, 0  ;;  %v75_v47 = vand.u32 65535, %v453_v37  ;;  %v76_v49 = vshrl.u32 %v453_v37, 16 }
  0x80   :  { %v38_v13 = vsel %vm37_vm1, %v36_v11, 0 }
  0x81   :  { %v40_v14 = vand.u32 31, %v38_v13  ;;  %v446_v17 = vshrl.u32 %v38_v13, 5 }
  0x83   :  { %v444_v15 = vsub.s32 32, %v40_v14  ;;  %v52_v19 = vshll.u32 %v407_v18, %v40_v14  ;;  %v55_v21 = vshll.u32 %v408_v20, %v40_v14  ;;  %v43_v26 = vshll.u32 %v410_v25, %v40_v14 }
  0x84   :  { %v46_v29 = vshll.u32 %v411_v27, %v40_v14  ;;  %v49_v32 = vshll.u32 %v412_v30, %v40_v14  ;;  %vm61_vm2 = vcmp.lt.s32.totalorder %v446_v17, 4  ;;  %vm58_vm3 = vcmp.lt.s32.totalorder %v446_v17, 1 }
  0x85   :  { %v53_v22 = vshrl.u32 %v408_v20, %v444_v15  ;;  %v56_v24 = vshrl.u32 %v409_v23, %v444_v15  ;;  %v44_v28 = vshrl.u32 %v411_v27, %v444_v15  ;;  %v47_v31 = vshrl.u32 %v412_v30, %v444_v15 }
  0x86   :  { %v50_v33 = vshrl.u32 %v407_v18, %v444_v15  ;;  %vm60_vm4 = vcmp.lt.s32.totalorder %v446_v17, 3  ;;  %vm59_vm5 = vcmp.lt.s32.totalorder %v446_v17, 2  ;;  %v42_v11 = vshrl.u32 %v410_v25, %v444_v15 }
  0x87   :  { %v54_v34 = vor.u32 %v53_v22, %v52_v19  ;;  %v57_v35 = vor.u32 %v56_v24, %v55_v21  ;;  %v45_v36 = vor.u32 %v44_v28, %v43_v26  ;;  %v48_v38 = vor.u32 %v47_v31, %v46_v29 }
  0x88   :  { %v51_v39 = vor.u32 %v50_v33, %v49_v32 }
  0x89   :  { %v67_v40 = vsel %vm61_vm2, %v54_v34, 920167782  ;;  %v71_v41 = vsel %vm61_vm2, %v57_v35, 1326507024  ;;  %v66_v42 = vsel %vm58_vm3, %v45_v36, %v48_v38  ;;  %v62_v19 = vsel %vm58_vm3, %v42_v11, %v45_v36 }
  0x8a   :  { %v68_v43 = vsel %vm60_vm4, %v51_v39, %v67_v40  ;;  %v70_v44 = vsel %vm58_vm3, %v48_v38, %v51_v39  ;;  %v72_v46 = vsel %vm60_vm4, %v54_v34, %v71_v41  ;;  %v63_v7 = vsel %vm61_vm2, %v51_v39, 2102212464 }
  0x8b   :  { %v69_v45 = vsel %vm59_vm5, %v66_v42, %v68_v43  ;;  %v73_v48 = vsel %vm59_vm5, %v70_v44, %v72_v46  ;;  %v64_v20 = vsel %vm60_vm4, %v48_v38, %v63_v7 }
  0x8c   :  { %v99_v50 = vand.u32 65535, %v69_v45  ;;  %v100_v51 = vshrl.u32 %v69_v45, 16  ;;  %v77_v52 = vand.u32 65535, %v73_v48  ;;  %v78_v53 = vshrl.u32 %v73_v48, 16 }
  0x8d   :  { %v65_v25 = vsel %vm59_vm5, %v62_v19, %v64_v20  ;;  %vm169_vm5 = vweird.f32 %v438_v6 }
  0x8e   :  { %v102_v54 = vmul.u32 %v100_v51, %v75_v47  ;;  %v103_v55 = vmul.u32 %v99_v50, %v76_v49  ;;  %v80_v56 = vmul.u32 %v78_v53, %v75_v47  ;;  %v81_v57 = vmul.u32 %v77_v52, %v76_v49 }
  0x8f   :  { %v101_v58 = vmul.u32 %v99_v50, %v75_v47  ;;  %v79_v60 = vmul.u32 %v77_v52, %v75_v47  ;;  %v104_v62 = vmul.u32 %v100_v51, %v76_v49  ;;  %v82_v63 = vmul.u32 %v78_v53, %v76_v49 }
  0x90   :  { %v105_v59 = vshll.u32 %v102_v54, 16  ;;  %v83_v61 = vshll.u32 %v80_v56, 16  ;;  %v107_v0 = vshll.u32 %v103_v55, 16  ;;  %v85_v3 = vshll.u32 %v81_v57, 16 }
  0x91   :  { %v106_v16 = vshrl.u32 %v102_v54, 16  ;;  %v84_v21 = vshrl.u32 %v80_v56, 16  ;;  %v108_v23 = vshrl.u32 %v103_v55, 16  ;;  %v86_v26 = vshrl.u32 %v81_v57, 16 }
  0x92   :  { %vm109_vm6 = vc.u32 %v101_v58, %v105_v59  ;;  %v111_v2 = vadd.s32 %v105_v59, %v101_v58  ;;  %vm87_vm7 = vc.u32 %v79_v60, %v83_v61  ;;  %v89_v4 = vadd.s32 %v83_v61, %v79_v60 }
  0x93   :  { %v110_v5 = vsel %vm109_vm6, 1, %v406_v1  ;;  %v88_v8 = vsel %vm87_vm7, 1, %v406_v1  ;;  %v119_v30 = vmul.u32 %v453_v37, %v65_v25  ;;  %vm185_vm6 = vcmask 138248  }
  0x94   :  { %v112_v9 = vadd.s32 %v110_v5, %v104_v62  ;;  %vm113_vm8 = vc.u32 %v111_v2, %v107_v0  ;;  %v90_v12 = vadd.s32 %v88_v8, %v82_v63  ;;  %vm91_vm9 = vc.u32 %v89_v4, %v85_v3 }
  0x95   :  { %v114_v13 = vsel %vm113_vm8, 1, %v406_v1  ;;  %v92_v14 = vsel %vm91_vm9, 1, %v406_v1  ;;  %v115_v1 = vadd.s32 %v111_v2, %v107_v0  ;;  %vm345_vm7 = vcmask 269448  }
  0x96   :  { %v116_v18 = vadd.s32 %v114_v13, %v112_v9  ;;  %v94_v22 = vadd.s32 %v92_v14, %v90_v12 }
  0x98   :  { %v117_v24 = vadd.s32 %v116_v18, %v106_v16  ;;  %v95_v15 = vadd.s32 %v94_v22, %v84_v21 }
  0x9a   :  { %v118_v27 = vadd.s32 %v117_v24, %v108_v23  ;;  %v96_v28 = vadd.s32 %v95_v15, %v86_v26 }
  0x9c   :  { %v122_v29 = vadd.s32 1, %v118_v27  ;;  %vm121_vm10 = vc.u32 %v96_v28, %v115_v1  ;;  %v120_v42 = vadd.s32 %v115_v1, %v96_v28 }
  0x9e   :  { %v123_v31 = vsel %vm121_vm10, %v122_v29, %v118_v27 }
  0x9f   :  { %v124_v32 = vadd.s32 %v123_v31, %v119_v30 }
  0xa1   :  { %v125_v33 = vadd.s32 536870912, %v124_v32 }
  0xa3   :  { %v126_v34 = vshrl.u32 %v125_v33, 30 }
  0xa5   :  { %v127_v35 = vshll.u32 %v126_v34, 30  ;;  %v150_v55 = vsub.s32 4, %v126_v34 }
  0xa7   :  { %v128_v36 = vsub.s32 %v124_v32, %v127_v35  ;;  %v151_v60 = vsel %vm28_vm13, %v150_v55, %v126_v34 }
  0xa8   :  { %v153_v63 = vsel %vm27_vm14, 0, %v151_v60 }
  0xa9   :  { %vm129_vm11 = vcmp.lt.s32.totalorder %v128_v36, 0  ;;  %v130_v38 = vsub.s32 0, %v128_v36  ;;  %v170_v5 = vadd.s32 3, %v153_v63  ;;  %v331_v11 = vand.u32 3, %v153_v63 }
  0xab   :  { %v131_v39 = vsel %vm129_vm11, %v130_v38, %v128_v36  ;;  %v171_v12 = vand.u32 3, %v170_v5  ;;  %vm332_vm15 = vcmp.lt.s32.totalorder %v331_v11, 2  ;;  %vm333_vm0 = vcmp.eq.s32.totalorder %v331_v11, 0 }
  0xac   :  { %v132_v40 = vclz %v131_v39  ;;  %vm336_vm1 = vcmp.eq.s32.totalorder %v331_v11, 2 }
  0xad   :  { %vm172_vm2 = vcmp.lt.s32.totalorder %v171_v12, 2  ;;  %vm173_vm3 = vcmp.eq.s32.totalorder %v171_v12, 0  ;;  %vm176_vm4 = vcmp.eq.s32.totalorder %v171_v12, 2 }
  0xae   :  { %v364_v41 = vadd.s32 4294967294, %v132_v40 }
  0xb0   :  { %vm365_vm12 = vcmp.lt.s32.totalorder %v364_v41, 0 }
  0xb1   :  { %v135_v17 = vsel %vm365_vm12, 0, %v364_v41 }
  0xb2   :  { %v136_v43 = vsub.s32 32, %v135_v17  ;;  %v140_v44 = vsub.s32 4294967266, %v135_v17  ;;  %v137_v45 = vshll.u32 %v128_v36, %v135_v17 }
  0xb4   :  { %v138_v46 = vshrl.u32 %v120_v42, %v136_v43  ;;  %v141_v37 = vadd.s32 127, %v140_v44 }
  0xb6   :  { %v139_v47 = vor.u32 %v138_v46, %v137_v45  ;;  %v142_v48 = vshll.u32 %v141_v37, 23 }
  0xb8   :  { %v143_v49 = vor.u32 4788187, %v142_v48  ;;  %v146_v51 = vcvt.s32.f32 %v139_v47 }
  0xba   :  { %v144_v50 = vand.u32 2147483647, %v143_v49 }
  0xbc   :  { %v147_v52 = vmul.f32 %v146_v51, %v144_v50 }
  0xbe   :  { %v148_v53 = vxor.u32 2147483648, %v147_v52 }
  0xc0   :  { %v149_v54 = vsel %vm28_vm13, %v148_v53, %v147_v52 }
  0xc1   :  { %v152_v56 = vsel %vm27_vm14, %v438_v6, %v149_v54 }
  0xc2   :  { %v154_v57 = vmul.f32 %v152_v56, %v152_v56 }
  0xc4   :  { %v155_v58 = vmul.f32 -0.001358992, %v154_v57  ;;  %v162_v59 = vmul.f32 -0.00019511016, %v154_v57 }
  0xc6   :  { %v156_v61 = vadd.f32 0.041655596, %v155_v58  ;;  %v163_v62 = vadd.f32 0.008332121, %v162_v59 }
  0xc8   :  { %v157_v0 = vmul.f32 %v156_v61, %v154_v57  ;;  %v164_v2 = vmul.f32 %v163_v62, %v154_v57 }
  0xca   :  { %v158_v3 = vadd.f32 -0.4999988, %v157_v0  ;;  %v165_v4 = vadd.f32 -0.16666654, %v164_v2 }
  0xcc   :  { %v159_v7 = vmul.f32 %v158_v3, %v154_v57  ;;  %v166_v8 = vmul.f32 %v165_v4, %v154_v57 }
  0xce   :  { %v160_v9 = vadd.f32 1.0, %v159_v7  ;;  %v167_v10 = vadd.f32 1.0, %v166_v8 }
  0xd0   :  { %v168_v13 = vmul.f32 %v167_v10, %v152_v56  ;;  %v177_v14 = vxor.u32 2147483648, %v160_v9 }
  0xd2   :  { %v174_v16 = vxor.u32 2147483648, %v168_v13  ;;  %v338_v19 = vsel %vm336_vm1, %v177_v14, %v168_v13  ;;  %v178_v21 = vsel %vm176_vm4, %v177_v14, %v168_v13 }
  0xd4   :  { %v335_v18 = vsel %vm333_vm0, %v160_v9, %v174_v16  ;;  %v175_v20 = vsel %vm173_vm3, %v160_v9, %v174_v16 }
  0xd5   :  { %v339_v22 = vsel %vm332_vm15, %v335_v18, %v338_v19  ;;  %v179_v23 = vsel %vm172_vm2, %v175_v20, %v178_v21 }
  0xd6   :  { %v340_v24 = vsel %vm169_vm5, nan, %v339_v22  ;;  %v180_v26 = vsel %vm169_vm5, nan, %v179_v23 }
  0xd7   :  { %342 = vrot.lane.b32.xlu1 %v340_v24, %s413_s0  ;;  %182 = vrot.lane.b32.xlu0 %v180_v26, %s414_s1 }
 0x149   :  { %v343_v15 = vpop.permute.xlu1 %342  ;;  %v183_v25 = vpop.permute.xlu0 %182 }
 0x14a   :  { %186 = vst.msk [vmem:[#allocation2] sm:$0xff] %vm185_vm6, %v183_v25 }
 0x14b   :  { %346 = vst.msk [vmem:[#allocation2] sm:$0xff] %vm345_vm7, %v343_v15 }
 0x14c   :  { %357 = dma.vmem_to_hbm [thread:$0]  %s353_s14, 128, %s355_s17, [#allocation3]  }
 0x14d   :  { %404 = dma.done.wait [#allocation3], 128  }
 0x14e   :  { %405 = vsyncadd [#allocation3], 4294967168 }
 0x14f   :  { %362 = vsyncpa [#allocation3], 1 }

</bundles_post_ra>
